<compile_context>
chip_gen: v5e
topology: v5e:2x2
jax: 0.10.0
libtpu: 0.0.40
codegen_flags: <defaults>
</compile_context>

<pallas_src>
import math
import functools

import jax
import jax.numpy as jnp
from jax.experimental import pallas as pl
from jax.experimental.pallas import tpu as pltpu


def _build_pe(d_model: int, max_h: int, max_w: int) -> jnp.ndarray:
    """Deterministic sinusoidal 2D positional encoding (plain-JAX init-time glue;
    matches the PyTorch __init__ even/odd interleave for even d_model)."""
    assert d_model % 2 == 0, "d_model must be even (matches the PyTorch module)"
    half = d_model // 2
    h_pos = jnp.arange(max_h, dtype=jnp.float32)[:, None, None]          # (H,1,1)
    w_pos = jnp.arange(max_w, dtype=jnp.float32)[None, :, None]          # (1,W,1)
    div_term = jnp.exp(
        jnp.arange(0, d_model, 2, dtype=jnp.float32) * (-math.log(10000.0) / d_model)
    )                                                                     # (half,)
    even = jnp.sin(h_pos * div_term) + jnp.sin(w_pos * div_term)          # (H,W,half) -> pe[..., 0::2]
    odd = jnp.cos(h_pos * div_term) + jnp.cos(w_pos * div_term)           # (H,W,half) -> pe[..., 1::2]
    pe = jnp.stack([even, odd], axis=-1).reshape(max_h, max_w, d_model)   # interleave
    return pe.reshape(-1, 1, d_model)                                     # (H*W, 1, D) like the torch buffer


def _add_pe_kernel(x_ref, pe_ref, o_ref, *, tile_seq, batch, d_model):
    # x_ref / o_ref: (tile_seq, batch*d_model)   -- lane-dense block of the 2-D view.
    # pe_ref:        (pe_rows, d_model)          -- full pe table, resident in VMEM.
    i = pl.program_id(0)
    start = pl.multiple_of(i * tile_seq, tile_seq)
    pe_t = pe_ref[pl.ds(start, tile_seq), :]                  # (tile_seq, d_model)
    # Broadcast over batch = static unrolled loop over per-batch column windows.
    for b in range(batch):
        c0 = b * d_model
        o_ref[:, c0:c0 + d_model] = (x_ref[:, c0:c0 + d_model] + pe_t).astype(o_ref.dtype)


@functools.partial(jax.jit, static_argnames=("tile_seq",))
def positional_encoding_2d(x: jnp.ndarray, pe: jnp.ndarray, tile_seq: int | None = None):
    """x: (seq_len, batch, d_model); pe: (max_h*max_w, 1, d_model). Returns x + pe[:seq_len]."""
    seq_len, batch, d_model = x.shape
    pe_rows = pe.shape[0]
    assert seq_len <= pe_rows, "seq_len exceeds the positional-encoding buffer (max_h*max_w)"
    bd = batch * d_model

    # Free, contiguous reshapes -- no HBM copies.
    x2d = x.reshape(seq_len, bd)
    pe2d = pe.reshape(pe_rows, d_model).astype(x.dtype)

    if tile_seq is None:
        # Big tiles amortize per-grid-step overhead (~0.35us), but keep >=2 grid steps
        # so both TensorCores on v7x get work along the "parallel" axis.
        tile_seq = min(512, max(8, (((seq_len + 1) // 2) + 7) // 8 * 8))
    tile_seq = max(8, (int(tile_seq) // 8) * 8)

    # Cap the block so double-buffered x/out blocks stay well inside VMEM on every
    # generation (v7x has only 64 MiB physical VMEM).
    itemsize = jnp.dtype(x.dtype).itemsize
    max_rows = max(8, ((4 << 20) // max(1, bd * itemsize)) // 8 * 8)
    tile_seq = min(tile_seq, max_rows)

    grid = (pl.cdiv(seq_len, tile_seq),)

    # Guarantee the in-kernel pl.ds on the resident pe block never reads past its
    # allocation for the ragged last tile (pe is tiny, so this pad is cheap and rare).
    needed_rows = grid[0] * tile_seq
    if needed_rows > pe_rows:
        pe2d = jnp.pad(pe2d, ((0, needed_rows - pe_rows), (0, 0)))
    pe_rows_p = max(pe_rows, needed_rows)

    blk_bytes = tile_seq * bd * itemsize
    pe_bytes = pe_rows_p * d_model * jnp.dtype(pe2d.dtype).itemsize
    vmem_limit = int(min(max(4 * blk_bytes + 2 * pe_bytes + (2 << 20), 32 << 20), 100 << 20))

    kernel = functools.partial(
        _add_pe_kernel, tile_seq=tile_seq, batch=batch, d_model=d_model
    )

    out2d = pl.pallas_call(
        kernel,
        out_shape=jax.ShapeDtypeStruct((seq_len, bd), x.dtype),
        grid_spec=pltpu.PrefetchScalarGridSpec(
            num_scalar_prefetch=0,
            grid=grid,
            in_specs=[
                pl.BlockSpec((tile_seq, bd), lambda i: (i, 0)),           # x, streamed per tile
                pl.BlockSpec((pe_rows_p, d_model), lambda i: (0, 0)),     # pe, resident (loaded once)
            ],
            out_specs=pl.BlockSpec((tile_seq, bd), lambda i: (i, 0)),
        ),
        compiler_params=pltpu.CompilerParams(
            dimension_semantics=("parallel",),
            vmem_limit_bytes=vmem_limit,
        ),
    )(x2d, pe2d)

    return out2d.reshape(seq_len, batch, d_model)


if __name__ == "__main__":
    # Module config: d_model=32, max_h=max_w=16 (small but consistent shapes).
    d_model, max_h, max_w = 32, 16, 16
    batch = 2
    H, W = 16, 16
    seq_len = H * W  # 256

    pe = _build_pe(d_model, max_h, max_w)     # (256, 1, 32), analogue of the torch buffer

    key = jax.random.PRNGKey(0)
    x = jax.random.normal(key, (seq_len, batch, d_model), dtype=jnp.float32)

    out = positional_encoding_2d(x, pe)
    out = jax.block_until_ready(out)

    # Reference check (pure JAX broadcast add, same semantics as the PyTorch forward).
    ref = x + pe[:seq_len]
    assert out.shape == x.shape and out.dtype == x.dtype
    assert jnp.allclose(out, ref, atol=1e-6, rtol=1e-6)

    print("KERNEL_OK")
</pallas_src>

<mosaic_0001>
module attributes {stable_mosaic.version = 11 : i64} {
  func.func @_add_pe_kernel(%arg0: i32, %arg1: memref<128x64xf32, #tpu.memory_space<vmem>>, %arg2: memref<256x32xf32, #tpu.memory_space<vmem>>, %arg3: memref<128x64xf32, #tpu.memory_space<vmem>>) attributes {dimension_semantics = [#tpu.dimension_semantics<parallel>], iteration_bounds = array<i64: 2>, scalar_prefetch = 0 : i64, scratch_operands = 0 : i64, tpu.core_type = #tpu.core_type<tc>, window_params = [{transform_indices = @transform_0, window_bounds = array<i64: 128, 64>}, {pipeline_mode = #tpu.pipeline_mode<synchronous>, transform_indices = @transform_1, window_bounds = array<i64: 256, 32>}, {transform_indices = @transform_2, window_bounds = array<i64: 128, 64>}]} {
    %c128_i32 = arith.constant 128 : i32
    %0 = arith.muli %arg0, %c128_i32 : i32
    %1 = tpu.assume_multiple %0, 128 : i32
    %2 = arith.index_cast %1 : i32 to index
    %c0 = arith.constant 0 : index
    %3 = vector.load %arg2[%2, %c0] : memref<256x32xf32, #tpu.memory_space<vmem>>, vector<128x32xf32>
    %c0_0 = arith.constant 0 : index
    %c0_1 = arith.constant 0 : index
    %4 = vector.load %arg1[%c0_0, %c0_1] : memref<128x64xf32, #tpu.memory_space<vmem>>, vector<128x32xf32>
    %5 = arith.addf %4, %3 : vector<128x32xf32>
    %c0_2 = arith.constant 0 : index
    %c0_3 = arith.constant 0 : index
    %6 = vector.load %arg3[%c0_2, %c0_3] : memref<128x64xf32, #tpu.memory_space<vmem>>, vector<128x32xf32>
    tpu.vector_store %arg3[%c0_2, %c0_3], %5 {strides = array<i32>} : memref<128x64xf32, #tpu.memory_space<vmem>>, vector<128x32xf32>,
    %c0_4 = arith.constant 0 : index
    %c32 = arith.constant 32 : index
    %7 = vector.load %arg1[%c0_4, %c32] : memref<128x64xf32, #tpu.memory_space<vmem>>, vector<128x32xf32>
    %8 = arith.addf %7, %3 : vector<128x32xf32>
    %c0_5 = arith.constant 0 : index
    %c32_6 = arith.constant 32 : index
    %9 = vector.load %arg3[%c0_5, %c32_6] : memref<128x64xf32, #tpu.memory_space<vmem>>, vector<128x32xf32>
    tpu.vector_store %arg3[%c0_5, %c32_6], %8 {strides = array<i32>} : memref<128x64xf32, #tpu.memory_space<vmem>>, vector<128x32xf32>,
    return
  }
  func.func @transform_0(%arg0: i32) -> (i32, i32) {
    %c0_i32 = arith.constant 0 : i32
    %c0_i32_0 = arith.constant 0 : i32
    return %arg0, %c0_i32 : i32, i32
  }
  func.func @transform_1(%arg0: i32) -> (i32, i32) {
    %c0_i32 = arith.constant 0 : i32
    %c0_i32_0 = arith.constant 0 : i32
    %c0_i32_1 = arith.constant 0 : i32
    return %c0_i32, %c0_i32_0 : i32, i32
  }
  func.func @transform_2(%arg0: i32) -> (i32, i32) {
    %c0_i32 = arith.constant 0 : i32
    %c0_i32_0 = arith.constant 0 : i32
    return %arg0, %c0_i32 : i32, i32
  }
}

</mosaic_0001>

<bundles_post_ra>
// kernel: positional_encoding_2d.1
= control target key start
LH: loop header
LB: loop body
LE: loop exit
PB: predicated region body
PF: predicated region fallthrough
CT: control target
= control target key end

     0   :  { %s430_s9 = smov 0   ;;  %s612_s0 = inlined_call_operand.vmem [shape: f32[256,64], index: 0, kind: input, shape index: {}]   ;;  %s613_s1 = inlined_call_operand.vmem [shape: f32[256,32], index: 1, kind: input, shape index: {}]   ;;  %s614_s2 = inlined_call_operand.vmem [shape: f32[256,64], index: 2, kind: output, shape index: {}]  }
   0x1 LB: > { %s385_s10 = sadd.s32 4294967295, %s412_s9   ;;  %p389_p0 = scmp.ge.s32.totalorder %s412_s9, 1  ;;  %s412_s9 = sphi %s430_s9, %s12_s9  }
   0x2   : > { %p113_p1 = scmp.lt.s32.totalorder %s412_s9, 3 }
   0x4   : > { %p114_p2 = pnand %p389_p0, %p113_p1 }
   0x5   : > { %s394_s11 = sshll.u32 (!%p114_p2), %s385_s10, 7  ;;  %s390_s15 = sshll.u32 (!%p114_p2), %s385_s10, 4 }
   0x6   : > { %117 = sbr.rel (%p114_p2) target bundleno = 170 (0xaa), region = 28  ;;  %s441_s14 = scalar_lea.vmem (!%p114_p2), %s613_s1, %s394_s11 }
   0x7   : > { %p136_p3 = scmp.lt.s32.totalorder (!%p114_p2), %s390_s15, 31  ;;  %s414_s16 = smov (!%p114_p2), 32  }
   0xb   : > { %v149_v0 = vld [vmem:[%s441_s14] sm:$0xff]  ;;  %v151_v1 = vld [vmem:[%s441_s14 + $0x10] sm:$0xff]  ;;  %s616_s15 = smov (!%p136_p3, %s390_s15), 31  ;;  %v150_v3 = vld [vmem:[%s441_s14 + $0x8] sm:$0xff]  ;;  %vm197_vm0 = vcmask 261120   ;;  %vm310_vm1 = vcmask 523520  }
   0xc   : > { %246 = vrot.lane.b32.xlu0 %v149_v0, %s414_s16  ;;  %250 = vrot.lane.b32.xlu1 %v151_v1, %s414_s16  ;;  %v153_v2 = vld [vmem:[%s441_s14 + $0x20] sm:$0xff]  ;;  %s391_s17 = sshll.u32 %s616_s15, 3  ;;  %v152_v4 = vld [vmem:[%s441_s14 + $0x18] sm:$0xff] }
   0xd   : > { %254 = vrot.lane.b32.xlu2 %v153_v2, %s414_s16  ;;  %s452_s20 = scalar_lea.vmem %s612_s0, %s391_s17  ;;  %s459_s23 = scalar_lea.vmem %s614_s2, %s391_s17  ;;  %v155_v8 = vld [vmem:[%s441_s14 + $0x30] sm:$0xff]  ;;  %v156_v16 = vld [vmem:[%s441_s14 + $0x38] sm:$0xff]  ;;  %v154_v18 = vld [vmem:[%s441_s14 + $0x28] sm:$0xff] }
   0xe   : > { %v462_v5 = vld [vmem:[%s452_s20] sm:$0xff]  ;;  %v465_v6 = vld [vmem:[%s452_s20 + $0x10] sm:$0xff]  ;;  %v468_v7 = vld [vmem:[%s452_s20 + $0x8] sm:$0xff] }
   0xf   : > { %v181_v9 = vadd.f32 %v462_v5, %v149_v0  ;;  %v183_v10 = vadd.f32 %v465_v6, %v151_v1  ;;  %v182_v11 = vadd.f32 %v468_v7, %v150_v3  ;;  %v475_v12 = vld [vmem:[%s452_s20 + $0x18] sm:$0xff]  ;;  %v478_v13 = vld [vmem:[%s452_s20 + $0x30] sm:$0xff]  ;;  %v486_v17 = vld [vmem:[%s452_s20 + $0x48] sm:$0xff] }
  0x10   : > { %v481_v14 = vld [vmem:[%s452_s20 + $0x38] sm:$0xff]  ;;  %v184_v15 = vadd.f32 %v475_v12, %v152_v4  ;;  %v187_v19 = vadd.f32 %v478_v13, %v155_v8  ;;  %v169_v20 = vld [vmem:[%s452_s20 + $0x20] sm:$0xff]  ;;  %v158_v22 = vld [vmem:[%s441_s14 + $0x48] sm:$0xff] }
  0x11   : > { %198 = vst.msk [vmem:[%s459_s23] sm:$0xff] %vm197_vm0, %v181_v9  ;;  %v188_v21 = vadd.f32 %v481_v14, %v156_v16  ;;  %v500_v23 = vld [vmem:[%s452_s20 + $0x50] sm:$0xff]  ;;  %v190_v24 = vadd.f32 %v486_v17, %v158_v22  ;;  %v506_v25 = vld [vmem:[%s452_s20 + $0x60] sm:$0xff]  ;;  %v185_v26 = vadd.f32 %v169_v20, %v153_v2  ;;  %v170_v28 = vld [vmem:[%s452_s20 + $0x28] sm:$0xff] }
  0x12   : > { %200 = vst.msk [vmem:[%s459_s23 + $0x10] sm:$0xff] %vm197_vm0, %v183_v10  ;;  %v159_v27 = vld [vmem:[%s441_s14 + $0x50] sm:$0xff]  ;;  %v161_v30 = vld [vmem:[%s441_s14 + $0x60] sm:$0xff]  ;;  %v518_v31 = vld [vmem:[%s452_s20 + $0x68] sm:$0xff]  ;;  %v186_v34 = vadd.f32 %v170_v28, %v154_v18 }
  0x13   : > { %199 = vst.msk [vmem:[%s459_s23 + $0x8] sm:$0xff] %vm197_vm0, %v182_v11  ;;  %v191_v29 = vadd.f32 %v500_v23, %v159_v27  ;;  %v193_v32 = vadd.f32 %v506_v25, %v161_v30  ;;  %v524_v33 = vld [vmem:[%s452_s20 + $0x78] sm:$0xff]  ;;  %v162_v35 = vld [vmem:[%s441_s14 + $0x68] sm:$0xff]  ;;  %v173_v36 = vld [vmem:[%s452_s20 + $0x40] sm:$0xff] }
  0x14   : > { %248 = vrot.lane.b32.xlu0 %v150_v3, %s414_s16  ;;  %252 = vrot.lane.b32.xlu1 %v152_v4, %s414_s16  ;;  %201 = vst.msk [vmem:[%s459_s23 + $0x18] sm:$0xff] %vm197_vm0, %v184_v15  ;;  %v194_v37 = vadd.f32 %v518_v31, %v162_v35  ;;  %v164_v38 = vld [vmem:[%s441_s14 + $0x78] sm:$0xff] }
  0x15   : > { %256 = vrot.lane.b32.xlu2 %v154_v18, %s414_s16  ;;  %204 = vst.msk [vmem:[%s459_s23 + $0x30] sm:$0xff] %vm197_vm0, %v187_v19  ;;  %v157_v39 = vld [vmem:[%s441_s14 + $0x40] sm:$0xff]  ;;  %v176_v40 = vld [vmem:[%s452_s20 + $0x58] sm:$0xff]  ;;  %v196_v41 = vadd.f32 %v524_v33, %v164_v38 }
  0x16   : > { %205 = vst.msk [vmem:[%s459_s23 + $0x38] sm:$0xff] %vm197_vm0, %v188_v21  ;;  %v179_v42 = vld [vmem:[%s452_s20 + $0x70] sm:$0xff]  ;;  %v189_v43 = vadd.f32 %v173_v36, %v157_v39  ;;  %v160_v44 = vld [vmem:[%s441_s14 + $0x58] sm:$0xff] }
  0x17   : > { %207 = vst.msk [vmem:[%s459_s23 + $0x48] sm:$0xff] %vm197_vm0, %v190_v24  ;;  %v192_v45 = vadd.f32 %v176_v40, %v160_v44  ;;  %v163_v46 = vld [vmem:[%s441_s14 + $0x70] sm:$0xff] }
  0x18   : > { %202 = vst.msk [vmem:[%s459_s23 + $0x20] sm:$0xff] %vm197_vm0, %v185_v26  ;;  %v195_v47 = vadd.f32 %v179_v42, %v163_v46 }
  0x19   : > { %208 = vst.msk [vmem:[%s459_s23 + $0x50] sm:$0xff] %vm197_vm0, %v191_v29 }
  0x1a   : > { %210 = vst.msk [vmem:[%s459_s23 + $0x60] sm:$0xff] %vm197_vm0, %v193_v32 }
  0x1b   : > { %203 = vst.msk [vmem:[%s459_s23 + $0x28] sm:$0xff] %vm197_vm0, %v186_v34 }
  0x1c   : > { %258 = vrot.lane.b32.xlu0 %v155_v8, %s414_s16  ;;  %260 = vrot.lane.b32.xlu1 %v156_v16, %s414_s16  ;;  %211 = vst.msk [vmem:[%s459_s23 + $0x68] sm:$0xff] %vm197_vm0, %v194_v37 }
  0x1d   : > { %262 = vrot.lane.b32.xlu2 %v157_v39, %s414_s16  ;;  %213 = vst.msk [vmem:[%s459_s23 + $0x78] sm:$0xff] %vm197_vm0, %v196_v41 }
  0x1e   : > { %206 = vst.msk [vmem:[%s459_s23 + $0x40] sm:$0xff] %vm197_vm0, %v189_v43 }
  0x1f   : > { %209 = vst.msk [vmem:[%s459_s23 + $0x58] sm:$0xff] %vm197_vm0, %v192_v45 }
  0x20   : > { %212 = vst.msk [vmem:[%s459_s23 + $0x70] sm:$0xff] %vm197_vm0, %v195_v47 }
  0x24   : > { %264 = vrot.lane.b32.xlu0 %v158_v22, %s414_s16  ;;  %266 = vrot.lane.b32.xlu1 %v159_v27, %s414_s16 }
  0x25   : > { %268 = vrot.lane.b32.xlu2 %v160_v44, %s414_s16 }
  0x2c   : > { %270 = vrot.lane.b32.xlu0 %v161_v30, %s414_s16  ;;  %272 = vrot.lane.b32.xlu1 %v162_v35, %s414_s16 }
  0x2d   : > { %274 = vrot.lane.b32.xlu2 %v163_v46, %s414_s16 }
  0x34   : > { %276 = vrot.lane.b32.xlu0 %v164_v38, %s414_s16 }
  0x67   : > { %v255_v48 = vpop.permute.xlu2 %254 }
  0x68   : > { %v298_v49 = vadd.f32 %v255_v48, %v169_v20 }
  0x6a   : > { %315 = vst.msk [vmem:[%s459_s23 + $0x20] sm:$0xff] %vm310_vm1, %v298_v49 }
  0x6f   : > { %v257_v50 = vpop.permute.xlu2 %256 }
  0x70   : > { %v299_v51 = vadd.f32 %v257_v50, %v170_v28 }
  0x72   : > { %316 = vst.msk [vmem:[%s459_s23 + $0x28] sm:$0xff] %vm310_vm1, %v299_v51 }
  0x77   : > { %v263_v52 = vpop.permute.xlu2 %262 }
  0x78   : > { %v302_v53 = vadd.f32 %v263_v52, %v173_v36 }
  0x7a   : > { %319 = vst.msk [vmem:[%s459_s23 + $0x40] sm:$0xff] %vm310_vm1, %v302_v53 }
  0x7e   : > { %v247_v54 = vpop.permute.xlu0 %246  ;;  %v251_v55 = vpop.permute.xlu1 %250 }
  0x7f   : > { %v294_v56 = vadd.f32 %v247_v54, %v462_v5  ;;  %v296_v57 = vadd.f32 %v251_v55, %v465_v6  ;;  %v269_v58 = vpop.permute.xlu2 %268 }
  0x80   : > { %v305_v59 = vadd.f32 %v269_v58, %v176_v40 }
  0x81   : > { %311 = vst.msk [vmem:[%s459_s23] sm:$0xff] %vm310_vm1, %v294_v56 }
  0x82   : > { %313 = vst.msk [vmem:[%s459_s23 + $0x10] sm:$0xff] %vm310_vm1, %v296_v57 }
  0x83   : > { %322 = vst.msk [vmem:[%s459_s23 + $0x58] sm:$0xff] %vm310_vm1, %v305_v59 }
  0x86   : > { %v249_v60 = vpop.permute.xlu0 %248  ;;  %v253_v61 = vpop.permute.xlu1 %252 }
  0x87   : > { %v295_v62 = vadd.f32 %v249_v60, %v468_v7  ;;  %v297_v63 = vadd.f32 %v253_v61, %v475_v12  ;;  %v275_v0 = vpop.permute.xlu2 %274 }
  0x88   : > { %v308_v1 = vadd.f32 %v275_v0, %v179_v42 }
  0x89   : > { %312 = vst.msk [vmem:[%s459_s23 + $0x8] sm:$0xff] %vm310_vm1, %v295_v62 }
  0x8a   : > { %314 = vst.msk [vmem:[%s459_s23 + $0x18] sm:$0xff] %vm310_vm1, %v297_v63 }
  0x8b   : > { %325 = vst.msk [vmem:[%s459_s23 + $0x70] sm:$0xff] %vm310_vm1, %v308_v1 }
  0x8e   : > { %v259_v2 = vpop.permute.xlu0 %258  ;;  %v261_v3 = vpop.permute.xlu1 %260 }
  0x8f   : > { %v300_v4 = vadd.f32 %v259_v2, %v478_v13  ;;  %v301_v5 = vadd.f32 %v261_v3, %v481_v14 }
  0x91   : > { %317 = vst.msk [vmem:[%s459_s23 + $0x30] sm:$0xff] %vm310_vm1, %v300_v4 }
  0x92   : > { %318 = vst.msk [vmem:[%s459_s23 + $0x38] sm:$0xff] %vm310_vm1, %v301_v5 }
  0x96   : > { %v265_v6 = vpop.permute.xlu0 %264  ;;  %v267_v7 = vpop.permute.xlu1 %266 }
  0x97   : > { %v303_v8 = vadd.f32 %v265_v6, %v486_v17  ;;  %v304_v9 = vadd.f32 %v267_v7, %v500_v23 }
  0x99   : > { %320 = vst.msk [vmem:[%s459_s23 + $0x48] sm:$0xff] %vm310_vm1, %v303_v8 }
  0x9a   : > { %321 = vst.msk [vmem:[%s459_s23 + $0x50] sm:$0xff] %vm310_vm1, %v304_v9 }
  0x9e   : > { %v271_v10 = vpop.permute.xlu0 %270  ;;  %v273_v11 = vpop.permute.xlu1 %272 }
  0x9f   : > { %v306_v12 = vadd.f32 %v271_v10, %v506_v25  ;;  %v307_v13 = vadd.f32 %v273_v11, %v518_v31 }
  0xa1   : > { %323 = vst.msk [vmem:[%s459_s23 + $0x60] sm:$0xff] %vm310_vm1, %v306_v12 }
  0xa2   : > { %324 = vst.msk [vmem:[%s459_s23 + $0x68] sm:$0xff] %vm310_vm1, %v307_v13 }
  0xa6   : > { %v277_v14 = vpop.permute.xlu0 %276 }
  0xa7   : > { %v309_v15 = vadd.f32 %v277_v14, %v524_v33 }
  0xa9   : > { %326 = vst.msk [vmem:[%s459_s23 + $0x78] sm:$0xff] %vm310_vm1, %v309_v15 }
  0xaa PF: > { %s12_s9 = sadd.s32 1, %s412_s9  }
  0xab   : > { %p9_p4 = scmp.ge.s32.totalorder %s12_s9, 4  }
  0xad   :  { %11 = sbr.rel (!%p9_p4) target bundleno = 1 (0x1), region = 59 }

</bundles_post_ra>
